<compile_context>
chip_gen: v6e
topology: v6e:2x2x1
jax: 0.10.0
libtpu: 0.0.40
codegen_flags: <defaults>
</compile_context>

<pallas_src>
import jax
import jax.numpy as jnp
from jax.experimental import pallas as pl
from jax.experimental.pallas import tpu as pltpu


def _round_up(x, m):
    return ((x + m - 1) // m) * m


def _vmem_capacity_bytes():
    try:
        return int(pltpu.get_tpu_info().vmem_capacity_bytes)
    except Exception:
        return 128 * 1024 * 1024  # v5e/v6e default; conservative elsewhere


def _make_kernel(inv_len, use_mxu):
    def kernel(w_ref, x_ref, out_ref):
        # w_ref:   (C, C)       Conv1d(dim, dim, 1, bias=False) weight [out, in], f32
        # x_ref:   (B_t, C, L)  native dtype
        # out_ref: (B_t, C, L)
        # AdaptiveAvgPool1d(1): mean over the length (lane) axis, accumulated
        # in f32 WITHOUT materializing a full-tile f32 copy.
        pooled = jnp.sum(x_ref[...], axis=-1, dtype=jnp.float32) * inv_len   # (B_t, C_in)
        w = w_ref[...]                                                       # (C_out, C_in)

        # 1x1 Conv1d == per-batch (C_in,) -> (C_out,) linear map, no bias.
        if use_mxu:
            logits = jax.lax.dot_general(
                pooled, w,
                dimension_numbers=(((1,), (1,)), ((), ())),
                preferred_element_type=jnp.float32)                          # (B_t, C_out)
        else:
            # Small C: VPU mul + lane reduce beats a sliver-sized MXU matmul.
            logits = jnp.sum(pooled[:, None, :] * w[None, :, :], axis=-1)

        attn = jax.nn.sigmoid(logits).astype(out_ref.dtype)                  # (B_t, C_out)

        # Gate in native dtype: re-read x (cheap VMEM load), broadcast along lanes.
        out_ref[...] = x_ref[...] * attn[:, :, None]

    return kernel


def _pick_batch_tile(B, C, L, itemsize, tile_budget_bytes):
    """Largest batch tile whose *padded* (bt, C, L) block fits the budget,
    while keeping a minimum grid length (pipeline depth / v7x 2-TC split)."""
    sublane = max(8, 32 // itemsize)                 # f32 -> 8, bf16 -> 16, int8/fp8 -> 32
    padded_row = _round_up(C, sublane) * _round_up(L, 128) * itemsize
    bt_budget = max(1, tile_budget_bytes // max(padded_row, 1))
    min_grid = min(B, 4)                             # keep >=4 grid steps when possible
    bt_grid = max(1, pl.cdiv(B, min_grid))
    bt = max(1, min(B, bt_budget, bt_grid))
    return bt, padded_row


def channel_operation(x, conv_weight):
    """x: [B, C, L]; conv_weight: [C, C, 1] from Conv1d(dim, dim, 1, bias=False)."""
    B, C, L = x.shape
    w = conv_weight.reshape(C, C).astype(jnp.float32)        # (C_out, C_in)
    itemsize = x.dtype.itemsize

    vmem_cap = _vmem_capacity_bytes()
    # ~8 MiB tiles on 128 MiB parts (v5e/v6e), ~4 MiB on 64 MiB parts (v7x).
    tile_budget = min(8 * 1024 * 1024, vmem_cap // 16)
    bt, padded_row = _pick_batch_tile(B, C, L, itemsize, tile_budget)
    grid = (pl.cdiv(B, bt),)

    # Scoped VMEM: double-buffered in + out (4x padded tile), weight, small f32
    # temporaries, plus headroom; capped below physical VMEM (3/4 on v7x).
    tile_bytes = bt * padded_row
    weight_bytes = _round_up(C, 8) * _round_up(C, 128) * 4
    needed = 4 * tile_bytes + 2 * weight_bytes + 2 * 1024 * 1024
    vmem_limit = int(min(max(needed, 16 * 1024 * 1024),
                         min(64 * 1024 * 1024, (3 * vmem_cap) // 4)))

    kernel = _make_kernel(inv_len=1.0 / L, use_mxu=(C >= 64))

    cost = pl.CostEstimate(
        flops=2 * B * C * L + 2 * B * C * C,
        transcendentals=B * C,
        bytes_accessed=2 * B * C * L * itemsize + C * C * 4,
    )

    # TODO(synk): if a single (1, C, L) slab ever exceeds VMEM, a two-pass
    # variant (pooled-gate kernel, then L-tiled multiply kernel) is needed;
    # not required for CAS-ViT-scale shapes.
    return pl.pallas_call(
        kernel,
        out_shape=jax.ShapeDtypeStruct((B, C, L), x.dtype),
        grid=grid,
        in_specs=[
            pl.BlockSpec((C, C), lambda b: (0, 0)),           # weight, replicated
            pl.BlockSpec((bt, C, L), lambda b: (b, 0, 0)),    # batch tile of x
        ],
        out_specs=pl.BlockSpec((bt, C, L), lambda b: (b, 0, 0)),
        compiler_params=pltpu.CompilerParams(
            dimension_semantics=("parallel",),
            vmem_limit_bytes=vmem_limit),
        cost_estimate=cost,
    )(w, x)


def _reference(x, conv_weight):
    """Pure-JAX reference mirroring the PyTorch module."""
    B, C, L = x.shape
    w = conv_weight.reshape(C, C)
    pooled = jnp.mean(x, axis=-1)                    # AdaptiveAvgPool1d(1)
    logits = jnp.einsum("oi,bi->bo", w, pooled)      # Conv1d(dim, dim, 1, bias=False)
    attn = jax.nn.sigmoid(logits)                    # Sigmoid
    return x * attn[:, :, None]                      # x * block(x)


if __name__ == "__main__":
    B, dim, L = 2, 4, 16

    key = jax.random.PRNGKey(0)
    k_x, k_w = jax.random.split(key, 2)

    x = jax.random.normal(k_x, (B, dim, L), dtype=jnp.float32)
    # Conv1d(dim, dim, 1, bias=False): weight shape (dim, dim, 1)
    conv_weight = jax.random.normal(k_w, (dim, dim, 1), dtype=jnp.float32) * 0.5

    out = channel_operation(x, conv_weight)
    out = jax.block_until_ready(out)

    ref = _reference(x, conv_weight)
    assert out.shape == (B, dim, L)
    assert jnp.allclose(out, ref, atol=1e-5, rtol=1e-5), "mismatch vs reference"

    print("KERNEL_OK")
</pallas_src>

<mosaic_0001>
module attributes {stable_mosaic.version = 11 : i64} {
  func.func @kernel(%arg0: i32, %arg1: memref<4x4xf32, #tpu.memory_space<vmem>>, %arg2: memref<1x4x16xf32, #tpu.memory_space<vmem>>, %arg3: memref<1x4x16xf32, #tpu.memory_space<vmem>>) attributes {dimension_semantics = [#tpu.dimension_semantics<parallel>], iteration_bounds = array<i64: 2>, scalar_prefetch = 0 : i64, scratch_operands = 0 : i64, tpu.core_type = #tpu.core_type<tc>, window_params = [{pipeline_mode = #tpu.pipeline_mode<synchronous>, transform_indices = @transform_0, window_bounds = array<i64: 4, 4>}, {transform_indices = @transform_1, window_bounds = array<i64: 1, 4, 16>}, {transform_indices = @transform_2, window_bounds = array<i64: 1, 4, 16>}]} {
    %c0 = arith.constant 0 : index
    %c0_0 = arith.constant 0 : index
    %c0_1 = arith.constant 0 : index
    %0 = vector.load %arg2[%c0, %c0_0, %c0_1] : memref<1x4x16xf32, #tpu.memory_space<vmem>>, vector<1x4x16xf32>
    %cst = arith.constant dense<0.000000e+00> : vector<1x4xf32>
    %1 = vector.multi_reduction <add>, %0, %cst [2] : vector<1x4x16xf32> to vector<1x4xf32>
    %cst_2 = arith.constant 6.250000e-02 : f32
    %2 = vector.broadcast %cst_2 : f32 to vector<1x4xf32>
    %3 = arith.mulf %1, %2 : vector<1x4xf32>
    %c0_3 = arith.constant 0 : index
    %c0_4 = arith.constant 0 : index
    %4 = vector.load %arg1[%c0_3, %c0_4] : memref<4x4xf32, #tpu.memory_space<vmem>>, vector<4x4xf32>
    %5 = vector.shape_cast %3 : vector<1x4xf32> to vector<1x1x4xf32>
    %6 = vector.shape_cast %4 : vector<4x4xf32> to vector<1x4x4xf32>
    %7 = vector.broadcast %5 : vector<1x1x4xf32> to vector<1x4x4xf32>
    %8 = arith.mulf %7, %6 : vector<1x4x4xf32>
    %cst_5 = arith.constant dense<0.000000e+00> : vector<1x4xf32>
    %9 = vector.multi_reduction <add>, %8, %cst_5 [2] : vector<1x4x4xf32> to vector<1x4xf32>
    %10 = arith.negf %9 : vector<1x4xf32>
    %11 = math.exp %10 : vector<1x4xf32>
    %cst_6 = arith.constant 1.000000e+00 : f32
    %12 = vector.broadcast %cst_6 : f32 to vector<1x4xf32>
    %13 = arith.addf %12, %11 : vector<1x4xf32>
    %14 = arith.divf %12, %13 : vector<1x4xf32>
    %c0_7 = arith.constant 0 : index
    %c0_8 = arith.constant 0 : index
    %c0_9 = arith.constant 0 : index
    %15 = vector.load %arg2[%c0_7, %c0_8, %c0_9] : memref<1x4x16xf32, #tpu.memory_space<vmem>>, vector<1x4x16xf32>
    %16 = vector.shape_cast %14 : vector<1x4xf32> to vector<1x4x1xf32>
    %17 = vector.broadcast %16 : vector<1x4x1xf32> to vector<1x4x16xf32>
    %18 = arith.mulf %15, %17 : vector<1x4x16xf32>
    %c0_10 = arith.constant 0 : index
    %c0_11 = arith.constant 0 : index
    %c0_12 = arith.constant 0 : index
    %19 = vector.load %arg3[%c0_10, %c0_11, %c0_12] : memref<1x4x16xf32, #tpu.memory_space<vmem>>, vector<1x4x16xf32>
    tpu.vector_store %arg3[%c0_10, %c0_11, %c0_12], %18 {strides = array<i32>} : memref<1x4x16xf32, #tpu.memory_space<vmem>>, vector<1x4x16xf32>,
    return
  }
  func.func @transform_0(%arg0: i32) -> (i32, i32) {
    %c0_i32 = arith.constant 0 : i32
    %c0_i32_0 = arith.constant 0 : i32
    %c0_i32_1 = arith.constant 0 : i32
    return %c0_i32, %c0_i32_0 : i32, i32
  }
  func.func @transform_1(%arg0: i32) -> (i32, i32, i32) {
    %c0_i32 = arith.constant 0 : i32
    %c0_i32_0 = arith.constant 0 : i32
    %c0_i32_1 = arith.constant 0 : i32
    return %arg0, %c0_i32, %c0_i32_0 : i32, i32, i32
  }
  func.func @transform_2(%arg0: i32) -> (i32, i32, i32) {
    %c0_i32 = arith.constant 0 : i32
    %c0_i32_0 = arith.constant 0 : i32
    %c0_i32_1 = arith.constant 0 : i32
    return %arg0, %c0_i32, %c0_i32_0 : i32, i32, i32
  }
}

</mosaic_0001>

<bundles_post_ra>
// kernel: tpu_custom_call.1
= control target key start
LH: loop header
LB: loop body
LE: loop exit
PB: predicated region body
PF: predicated region fallthrough
CT: control target
= control target key end

     0   :  { %7 = vsyncpa [#allocation3], 0  ;;  %s759_s0 = inlined_call_operand.hbm [shape: f32[4,4], index: 0, kind: input, shape index: {}]   ;;  %s760_s1 = inlined_call_operand.hbm [shape: f32[2,4,16], index: 1, kind: input, shape index: {}]   ;;  %s761_s2 = inlined_call_operand.hbm [shape: f32[2,4,16], index: 2, kind: output, shape index: {}]  }
   0x1   :  { %8 = vsyncpa [#allocation6], 0 }
   0x2   :  { %10 = vsyncpa [#allocation6 + $0x1], 0 }
   0x3   :  { %11 = vsyncpa [#allocation4], 0 }
   0x4   :  { %13 = vsyncpa [#allocation4 + $0x1], 0  ;;  %s587_s9 = smov 0   ;;  %s589_s10 = smov 0  }
   0x5   :  { %s591_s11 = smov 0   ;;  %s593_s12 = smov 0  }
   0x6 LB: > { %s608_s13 = sadd.s32 4294967295, %s566_s12   ;;  %s365_s14 = sadd.s32 4294967294, %s566_s12   ;;  %s566_s12 = sphi %s593_s12, %s784_s12   ;;  %s562_s11 = sphi %s591_s11, %s783_s11   ;;  %s558_s10 = sphi %s589_s10, %s782_s10   ;;  %s554_s9 = sphi %s587_s9, %s781_s9  }
   0x7   : > { %p60_p0 = scmp.ne.s32.totalorder %s558_s10, %s554_s9  ;;  %p762_p1 = scmp.eq.s32.totalorder %s608_s13, 0 }
   0x8   : > { %p90_p3 = scmp.eq.s32.totalorder %s365_s14, 1  ;;  %p366_p5 = scmp.ge.s32.totalorder %s566_s12, 1 }
   0x9   : > { %p617_p4 = por %p762_p1, %p60_p0  ;;  %p97_p7 = scmp.lt.s32.totalorder %s566_s12, 3 }
   0xa   : > { %p622_p6 = por %p90_p3, %p60_p0  ;;  %s568_s18 = smov [#allocation2]  }
   0xb   : > { %s766_s15 = scalar_select %p617_p4, 1, 0 }
   0xc   : > { %s767_s16 = scalar_select %p622_p6, 1, 0 }
   0xd   : > { %p627_p8 = pnand %p366_p5, %p97_p7  ;;  %s110_s19 = sshll.u32 %s568_s18, 4  ;;  %s111_s19 = int_to_ptr.vmem [resolvable:$true] %s110_s19 }
   0xe   : > { %s635_s20 = sadd.s32 1, %s566_s12   ;;  %s47_s24 = sadd.s32 1, %s562_s11 }
   0xf   : > { %s768_s17 = scalar_select %p627_p8, 1, 0 }
  0x10   : > { %p388_p10 = pneg %p627_p8  ;;  %s44_s22 = ssub.s32 %s566_s12, %s635_s20 }
  0x11   : > { %p645_p12 = scmp.eq.s32.totalorder %s44_s22, 0  ;;  %p54_p13 = scmp.ne.s32.totalorder %s562_s11, %s558_s10 }
  0x12   : > { %p639_p11 = pnand %p388_p10, %p762_p1  ;;  %s455_s25 = scalar_lea.vmem %s111_s19, 64 }
  0x13   : > { %p456_p3 = scmp.ne.s32.totalorder %s111_s19, %s455_s25  ;;  %p463_p9 = scmp.lt.s32.totalorder %s111_s19, %s111_s19 }
  0x14   : > { %p446_p0 = pneg %p639_p11  ;;  %p464_p2 = scmp.lt.s32.totalorder %s455_s25, %s455_s25 }
  0x16   : > { %p458_p5 = pnand %p456_p3, %p446_p0  ;;  %p465_p10 = por %p464_p2, %p463_p9 }
  0x18   : > { %p459_p7 = pneg %p458_p5 }
  0x1a   : > { %p466_p1 = pnand %p465_p10, %p459_p7 }
  0x1c   : > { %469 = shalt.err (!%p466_p1)
}
  0x1d   : > { %391 = dma.hbm_to_vmem [thread:$0]  (!%p639_p11), %s759_s0, 64, %s111_s19, [#allocation3]  }
  0x1e   : > { %s662_s28 = scalar_select %p645_p12, %s562_s11, %s47_s24  }
  0x1f   : > { %p55_p1 = scmp.eq.s32.totalorder %s566_s12, 0  ;;  %p771_p2 = scmp.eq.s32.totalorder %s608_s13, 1 }
  0x20   : > { %p401_p0 = scmp.lt.s32.totalorder %s566_s12, 2  ;;  %s121_s30 = sand.u32 1, %s562_s11  }
  0x21   : > { %p670_p9 = por %p771_p2, %p54_p13  ;;  %p56_p3 = por %p55_p1, %p54_p13 }
  0x22   : > { %s369_s3 = sshll.u32 %s121_s30, 2  ;;  %s370_s4 = sshll.u32 %s566_s12, 6 }
  0x23   : > { %s772_s29 = scalar_select %p670_p9, 1, 0 }
  0x24   : > { %s683_s7 = scalar_lea.hbm %s760_s1, %s370_s4  ;;  %s125_s8 = scalar_lea.vmem [#allocation5], %s369_s3 }
  0x25   : > { %s132_s14 = sshll.u32 %s125_s8, 4  ;;  %p685_p11 = pnand %p401_p0, %p56_p3  ;;  %s133_s14 = int_to_ptr.vmem [resolvable:$true] %s132_s14 }
  0x26   : > { %s122_s19 = scalar_lea.sflag [#allocation6], %s121_s30  ;;  %s470_s21 = scalar_lea.hbm %s683_s7, 64 }
  0x27   : > { %p471_p12 = scmp.ne.s32.totalorder %s683_s7, %s470_s21  ;;  %p472_p13 = pneg %p685_p11 }
  0x28   : > { %s475_s24 = scalar_lea.hbm %s760_s1, 128  ;;  %p476_p10 = scmp.lt.s32.totalorder %s683_s7, %s760_s1 }
  0x29   : > { %p473_p5 = pnand %p472_p13, %p471_p12  ;;  %p477_p1 = scmp.lt.s32.totalorder %s475_s24, %s470_s21 }
  0x2b   : > { %p474_p7 = pneg %p473_p5  ;;  %p478_p2 = por %p477_p1, %p476_p10 }
  0x2d   : > { %p479_p0 = pnand %p478_p2, %p474_p7 }
  0x2f   : > { %482 = shalt.err (!%p479_p0)
}
  0x30   : > { %s483_s27 = scalar_lea.vmem %s133_s14, 64  ;;  %s569_s30 = smov [#allocation5]  }
  0x31   : > { %p484_p3 = scmp.ne.s32.totalorder %s133_s14, %s483_s27  ;;  %s488_s3 = sshll.u32 %s569_s30, 4  ;;  %s489_s3 = int_to_ptr.vmem [resolvable:$false] %s488_s3 }
  0x32   : > { %s490_s4 = scalar_lea.vmem %s489_s3, 128  ;;  %p491_p12 = scmp.lt.s32.totalorder %s133_s14, %s489_s3 }
  0x33   : > { %p486_p6 = pnand %p484_p3, %p472_p13  ;;  %p492_p5 = scmp.lt.s32.totalorder %s490_s4, %s483_s27 }
  0x35   : > { %p487_p9 = pneg %p486_p6  ;;  %p493_p4 = por %p492_p5, %p491_p12 }
  0x37   : > { %p494_p8 = pnand %p493_p4, %p487_p9 }
  0x39   : > { %497 = shalt.err (!%p494_p8)
}
  0x3a   : > { %395 = dma.hbm_to_vmem [thread:$0]  (!%p685_p11), %s683_s7, 64, %s133_s14, %s122_s19  }
  0x3b   : > { %p774_p7 = scmp.ne.s32.totalorder %s768_s17, 0 }
  0x3c   : > { %p775_p10 = scmp.eq.s32.totalorder (!%p774_p7), %s608_s13, 0 }
  0x3d   : > { %141 = sbr.rel (%p774_p7) target bundleno = 542 (0x21e), region = 28 }
  0x42   : > { %541 = dma.done.wait (%p775_p10), [#allocation3], 64   ;;  %p776_p6 = pmov %p775_p10 }
  0x43   : > { %s710_s5 = sand.u32 1, %s558_s10   ;;  %p777_p4 = scmp.ne.s32.totalorder %s766_s15, 0 }
  0x44   : > { %543 = vsyncadd (%p776_p6), [#allocation3], 4294967232  ;;  %s373_s6 = sshll.u32 %s710_s5, 2  ;;  %s148_s8 = scalar_lea.sflag [#allocation6], %s710_s5 }
  0x45   : > { %s151_s7 = scalar_lea.vmem [#allocation5], %s373_s6 }
  0x46   : > { %545 = dma.done.wait (%p777_p4), %s148_s8, 64  }
  0x47   : > { %547 = vsyncadd (%p777_p4), %s148_s8, 4294967232  ;;  %v180_v0 = vlaneseq  ;;  %vm173_vm0 = vcmask 125952   ;;  %v172_v4 = vld [vmem:[%s151_s7] sm:$0xf]  ;;  %v178_v5 = vld [vmem:[#allocation2] sm:$0xf] }
  0x48   : > { %v174_v6 = vsel %vm173_vm0, %v172_v4, 0.0  ;;  %v570_v12 = vmov 0   ;;  %vm250_vm1 = vcmask 1041409   ;;  %vm252_vm2 = vcmask 1042434   ;;  %s377_s15 = sshll.u32 %s608_s13, 6  ;;  %s171_s17 = scalar_lea.vmem [#allocation7], %s373_s6 }
  0x49   : > { %v181_v1 = vshrl.u32 %v180_v0, 7  ;;  %175 = vadd.xlane.f32.xlu0 %v174_v6  ;;  %438 = vset.pattern.permute.xlu1 %v570_v12  ;;  %v233_v14 = vand.u32 127, %v180_v0  ;;  %vm254_vm3 = vcmask 1043459   ;;  %vm257_vm4 = vcmask 27648   ;;  %s283_s14 = sshll.u32 %s171_s17, 4  ;;  %s281_s21 = scalar_lea.hbm %s761_s2, %s377_s15  ;;  %s284_s14 = int_to_ptr.vmem [resolvable:$true] %s283_s14 }
  0x4a   : > { %439 = vset.pattern.permute.xlu0 %v570_v12  ;;  %s270_s22 = scalar_lea.sflag [#allocation4], %s710_s5  ;;  %s498_s23 = scalar_lea.vmem %s284_s14, 64 }
  0x4b   : > { %v189_v2 = vsub.s32 1, %v181_v1  ;;  %v196_v3 = vsub.s32 2, %v181_v1  ;;  %v203_v9 = vsub.s32 3, %v181_v1  ;;  %v182_v11 = vsub.s32 0, %v181_v1  ;;  %p499_p8 = scmp.ne.s32.totalorder %s284_s14, %s498_s23  ;;  %p778_p9 = scmp.ne.s32.totalorder %s772_s29, 0 }
  0x4c   : > { %v236_v15 = vsub.s32 %v233_v14, %v181_v1  ;;  %s571_s24 = smov [#allocation7]  }
  0x4d   : > { %v190_v7 = vrot.slane %v178_v5, %v189_v2  ;;  %v197_v8 = vrot.slane %v178_v5, %v196_v3  ;;  %v204_v10 = vrot.slane %v178_v5, %v203_v9  ;;  %v183_v13 = vrot.slane %v178_v5, %v182_v11  ;;  %p500_p11 = pnand %p499_p8, %p778_p9  ;;  %s502_s13 = sshll.u32 %s571_s24, 4  ;;  %s503_s13 = int_to_ptr.vmem [resolvable:$false] %s502_s13 }
  0x4e   : > { %s504_s25 = scalar_lea.vmem %s503_s13, 128  ;;  %p505_p1 = scmp.lt.s32.totalorder %s284_s14, %s503_s13 }
  0x4f   : > { %192 = vbcast.lane.b32.xlu1 %v190_v7, 256  ;;  %p501_p13 = pneg %p500_p11  ;;  %p506_p2 = scmp.lt.s32.totalorder %s504_s25, %s498_s23 }
  0x51   : > { %p507_p0 = por %p506_p2, %p505_p1 }
  0x53   : > { %199 = vbcast.lane.b32.xlu1 %v197_v8, 256  ;;  %p508_p3 = pnand %p507_p0, %p501_p13 }
  0x57   : > { %206 = vbcast.lane.b32.xlu1 %v204_v10, 256 }
  0x5f   : > { %185 = vbcast.lane.b32.xlu0 %v183_v13, 256 }
  0xc1   : > { %v193_v17 = vpop.permute.xlu1 %192 }
  0xc5   : > { %v200_v21 = vpop.permute.xlu1 %199 }
  0xc9   : > { %v207_v24 = vpop.permute.xlu1 %206 }
  0xd2   : > { %v176_v16 = vpop.xlane.xlu0 %175 }
  0xd3   : > { %v177_v18 = vmul.f32 0.0625, %v176_v16 }
  0xd5   : > { %v213_v22 = vmul.f32 %v193_v17, %v177_v18  ;;  %v214_v23 = vmul.f32 %v200_v21, %v177_v18  ;;  %v215_v25 = vmul.f32 %v207_v24, %v177_v18 }
  0xd6   : > { %v186_v19 = vpop.permute.xlu0 %185 }
  0xd7   : > { %v212_v20 = vmul.f32 %v186_v19, %v177_v18 }
  0xd9   : > { %221 = vperm.xlu1 %438, %v212_v20  }
  0xdd   : > { %224 = vperm.xlu1 %438, %v213_v22  }
  0xe1   : > { %227 = vperm.xlu1 %438, %v214_v23  }
  0xe5   : > { %230 = vperm.xlu1 %438, %v215_v25  }
 0x154   : > { %v222_v26 = vpop.permute.xlu1 %221 }
 0x155   : > { %v237_v31 = vrot.slane %v222_v26, %v236_v15 }
 0x158   : > { %v225_v27 = vpop.permute.xlu1 %224 }
 0x159   : > { %v241_v29 = vrot.slane %v225_v27, %v236_v15 }
 0x15b   : > { %v251_v33 = vsel %vm250_vm1, %v241_v29, %v237_v31 }
 0x15c   : > { %v228_v28 = vpop.permute.xlu1 %227 }
 0x15d   : > { %v245_v30 = vrot.slane %v228_v28, %v236_v15 }
 0x15f   : > { %v253_v35 = vsel %vm252_vm2, %v245_v30, %v251_v33 }
 0x160   : > { %v231_v32 = vpop.permute.xlu1 %230 }
 0x161   : > { %v249_v34 = vrot.slane %v231_v32, %v236_v15 }
 0x163   : > { %v255_v36 = vsel %vm254_vm3, %v249_v34, %v253_v35 }
 0x164   : > { %v258_v37 = vsel %vm257_vm4, %v255_v36, 0.0 }
 0x165   : > { %259 = vadd.xlane.f32.xlu0 %v258_v37 }
 0x1ee   : > { %v260_v38 = vpop.xlane.xlu0 %259 }
 0x1ef   : > { %v375_v39 = vmul.f32 -1.442695, %v260_v38 }
 0x1f1   : > { %440 = vpow2.f32 %v375_v39 }
 0x1fe   : > { %v441_v40 = vpop.eup %440 }
 0x1ff   : > { %v264_v41 = vadd.f32 1.0, %v441_v40 }
 0x201   : > { %442 = vrcp.f32 %v264_v41 }
 0x20e   : > { %v443_v42 = vpop.eup %442 }
 0x20f   : > { %v267_v43 = vmul.f32 %v443_v42, %v172_v4 }
 0x211   : > { %268 = vst.msk [vmem:[%s171_s17] sm:$0xf] %vm173_vm0, %v267_v43 }
 0x212   : > { %511 = shalt.err (!%p508_p3)
}
 0x213   : > { %s512_s26 = scalar_lea.hbm %s281_s21, 64  ;;  %s516_s3 = scalar_lea.hbm %s761_s2, 128 }
 0x214   : > { %p513_p12 = scmp.ne.s32.totalorder %s281_s21, %s512_s26  ;;  %p517_p10 = scmp.lt.s32.totalorder %s281_s21, %s761_s2 }
 0x215   : > { %p518_p6 = scmp.lt.s32.totalorder %s516_s3, %s512_s26 }
 0x216   : > { %p514_p5 = pnand %p513_p12, %p778_p9 }
 0x217   : > { %p519_p4 = por %p518_p6, %p517_p10 }
 0x218   : > { %p515_p7 = pneg %p514_p5 }
 0x21a   : > { %p520_p8 = pnand %p519_p4, %p515_p7 }
 0x21c   : > { %523 = shalt.err (!%p520_p8)
}
 0x21d   : > { %386 = dma.vmem_to_hbm [thread:$0]  (%p778_p9), %s284_s14, 64, %s281_s21, %s270_s22  }
 0x21e PF: > { %s295_s6 = sand.u32 1, %s554_s9   ;;  %p779_p11 = scmp.ne.s32.totalorder %s767_s16, 0 }
 0x21f   : > { %p780_p13 = scmp.ge.s32.totalorder %s566_s12, 2  ;;  %s296_s8 = scalar_lea.sflag [#allocation4], %s295_s6 }
 0x221   : > { %p397_p1 = pnand %p780_p13, %p779_p11 }
 0x223   : > { %p398_p2 = pneg %p397_p1 }
 0x225   : > { %549 = dma.done.wait (%p398_p2), %s296_s8, 64  }
 0x226   : > { %551 = vsyncadd (%p398_p2), %s296_s8, 4294967232  ;;  %p16_p0 = scmp.ge.s32.totalorder %s635_s20, 4   ;;  %s781_s9 = smov %s558_s10 }
 0x227   : > { %s782_s10 = smov %s562_s11  ;;  %s783_s11 = smov %s662_s28 }
 0x228   : > { %s784_s12 = smov %s635_s20  ;;  %18 = sbr.rel (!%p16_p0) target bundleno = 6 (0x6), region = 78 }
 0x22d   :  { %301 = vsyncpa [#allocation3], 1 }
 0x22e   :  { %303 = vsyncpa [#allocation3 + $0x1], 1 }
 0x22f   :  { %304 = vsyncpa [#allocation6], 1 }
 0x230   :  { %306 = vsyncpa [#allocation6 + $0x1], 1 }
 0x231   :  { %307 = vsyncpa [#allocation4], 1 }
 0x232   :  { %309 = vsyncpa [#allocation4 + $0x1], 1 }

</bundles_post_ra>
